<compile_context>
chip_gen: v6e
topology: v6e:2x2x1
jax: 0.10.0
libtpu: 0.0.40
codegen_flags: <defaults>
</compile_context>

<pallas_src>
import math
import functools
import numpy as np
import jax
import jax.numpy as jnp
from jax.experimental import pallas as pl
from jax.experimental.pallas import tpu as pltpu

EPS = 1e-5  # PyTorch BatchNorm default eps


def _round_up(x, m):
    return ((x + m - 1) // m) * m


def _bn_affine(bn):
    g = np.asarray(bn["gamma"], np.float32)
    b = np.asarray(bn["beta"], np.float32)
    m = np.asarray(bn["mean"], np.float32)
    v = np.asarray(bn["var"], np.float32)
    s = g / np.sqrt(v + EPS)
    return s.astype(np.float32), (b - m * s).astype(np.float32)


# ---------------------------------------------------------------------------
# Kernel 1: tanh -> bn0 -> conv -> bn1 -> relu -> fc -> bn2 -> relu  (emit y in bf16)
# ---------------------------------------------------------------------------
def feature_kernel(bn0_ref, wt_ref, sub_ref, rel_ref, wfc_ref, b2_ref, y_ref, h_ref, *, C, K):
    B, D = sub_ref.shape
    pad = K // 2
    W = 2 * K + 1  # taps per channel (+1 folded bias) in the flat 1-D SMEM table

    # bn0 (eval) on the two "channels" of the stacked input.
    a = jnp.tanh(sub_ref[...]) * bn0_ref[0] + bn0_ref[1]        # [B, D]
    b = rel_ref[...] * bn0_ref[2] + bn0_ref[3]                  # [B, D]

    # Shifted, zero-padded copies for the K conv taps: tap(x, off)[b, p] = x[b, p + off].
    pos = jax.lax.broadcasted_iota(jnp.int32, (B, D), 1)

    def tap(x, off):
        if off == 0:
            return x
        r = pltpu.roll(x, shift=(-off) % D, axis=1)             # r[p] = x[(p + off) mod D]
        if off > 0:
            return jnp.where(pos >= D - off, 0.0, r)
        return jnp.where(pos < -off, 0.0, r)

    a_taps = [tap(a, k - pad) for k in range(K)]
    b_taps = [tap(b, k - pad) for k in range(K)]

    # Per out-channel conv (taps pre-scaled by bn1) + folded bias + relu, staged into the
    # bf16 slab h[:, c*D:(c+1)*D]; then ONE long-K MXU contraction against wfc [C*D, D_out].
    for c in range(C):                                           # static unroll (C small)
        base = c * W
        f = wt_ref[base] * a_taps[0] + wt_ref[base + K] * b_taps[0]
        for k in range(1, K):
            f = f + wt_ref[base + k] * a_taps[k] + wt_ref[base + K + k] * b_taps[k]
        f = f + wt_ref[base + 2 * K]                             # conv_b*s1 + t1 (folded)
        h_ref[:, c * D:(c + 1) * D] = jnp.maximum(f, 0.0).astype(h_ref.dtype)

    y = jnp.dot(h_ref[...], wfc_ref[...], preferred_element_type=jnp.float32)  # [B, D_out]
    y_ref[...] = jnp.maximum(y + b2_ref[...], 0.0).astype(y_ref.dtype)         # fc_b+bn2 folded, relu


# ---------------------------------------------------------------------------
# Kernel 2: scores tile = y @ ob_tile.T  (ob streamed in native [N, D] layout)
# ---------------------------------------------------------------------------
def scores_kernel(y_ref, ob_ref, out_ref):
    ob = ob_ref[...].astype(jnp.bfloat16)                        # [TN, D] cast in-VMEM (cheap)
    out_ref[...] = jax.lax.dot_general(
        y_ref[...], ob,
        dimension_numbers=(((1,), (1,)), ((), ())),              # 'bd,nd->bn'
        preferred_element_type=jnp.float32)


def convtranse_decode(params, sub, rel, ob, num_valid=None):
    """ConvTransE.forward(sub, rel, ob, all_triples_flag=True, train_flag=True) — dropout p=0.

    `ob` may carry extra trailing rows (e.g. the raw embedding table); only the first
    `num_valid` rows contribute to the returned scores (no host-side gather/copy needed).
    """
    B, D = sub.shape
    N = int(num_valid) if num_valid is not None else int(ob.shape[0])

    conv_w = np.asarray(params["conv_w"], np.float32)            # [C, 2, K]
    conv_b = np.asarray(params["conv_b"], np.float32)            # [C]
    C, _, K = conv_w.shape
    W = 2 * K + 1

    s0, t0 = _bn_affine(params["bn0"])                           # (2,)
    s1, t1 = _bn_affine(params["bn1"])                           # (C,)
    s2, t2 = _bn_affine(params["bn2"])                           # (D,)
    if B <= 1:                                                   # ConvTransE skips bn2 when batch_size == 1
        s2 = np.ones_like(s2)
        t2 = np.zeros_like(t2)

    bn0_vec = jnp.asarray([s0[0], t0[0], s0[1], t0[1]], dtype=jnp.float32)

    # Conv taps folded with bn1 scale; every (2K+1)-th slot = conv_b*s1 + t1. Flat 1-D SMEM.
    taps = conv_w.reshape(C, 2 * K) * s1[:, None]
    wt = np.concatenate([taps, (conv_b * s1 + t1)[:, None]], axis=1).reshape(-1).astype(np.float32)

    # fc weight folded with bn2 scale, laid out as one [C*D, D_out] bf16 matrix:
    # wfc[c*D+p, j] = fc_w[j, c*D+p] * s2[j]  (matches PyTorch's x.view(B, -1) flattening).
    fc_w = np.asarray(params["fc_w"], np.float32)                # [D_out, C*D]
    D_out = fc_w.shape[0]
    wfc = np.ascontiguousarray((fc_w * s2[:, None]).T)           # [C*D, D_out] f32
    bias2 = ((np.asarray(params["fc_b"], np.float32) * s2) + t2)[None, :].astype(np.float32)  # [1, D_out]

    vmem = pl.BlockSpec(memory_space=pltpu.MemorySpace.VMEM)
    smem = pl.BlockSpec(memory_space=pltpu.MemorySpace.SMEM)

    y = pl.pallas_call(
        functools.partial(feature_kernel, C=C, K=K),
        out_shape=jax.ShapeDtypeStruct((B, D_out), jnp.bfloat16),
        in_specs=[smem, smem, vmem, vmem, vmem, vmem],
        out_specs=vmem,
        scratch_shapes=[pltpu.VMEM((B, C * D), jnp.bfloat16)],   # bf16 feature slab for the fused fc
        compiler_params=pltpu.CompilerParams(vmem_limit_bytes=32 << 20),
    )(bn0_vec, jnp.asarray(wt),
      jnp.asarray(sub, jnp.float32), jnp.asarray(rel, jnp.float32),
      jnp.asarray(wfc, jnp.bfloat16), jnp.asarray(bias2))

    # scores = y @ ob[:N].T, ob streamed directly in native [N, D] f32 layout — no gather,
    # no transpose, no cast, no pad pass over the N x D table.
    ob = jnp.asarray(ob, jnp.float32)
    if N < 128:
        ob_arr = ob[:N]                                          # tiny: one full-extent tile
        TN = N
    else:
        ob_arr = ob                                              # zero-copy stream of the table
        TN = min(2048, _round_up(pl.cdiv(N, 2), 128))            # >=2 tiles keeps v7x megacore busy
        # keep double-buffered (ob tile f32 + out tile f32) under ~12 MiB of scoped VMEM
        tn_cap = max(128, (((12 << 20) // ((D_out + B) * 4 * 2)) // 128) * 128)
        TN = min(TN, tn_cap)
    num_tiles = pl.cdiv(N, TN)

    cost = pl.CostEstimate(
        flops=2 * B * D_out * num_tiles * TN,
        transcendentals=0,
        bytes_accessed=min(num_tiles * TN, int(ob_arr.shape[0])) * D_out * 4
                       + B * D_out * 2 + B * N * 4,
    )
    scores = pl.pallas_call(
        scores_kernel,
        out_shape=jax.ShapeDtypeStruct((B, N), jnp.float32),     # exact N; partial last tile is masked
        grid=(num_tiles,),
        in_specs=[pl.BlockSpec((B, D_out), lambda j: (0, 0)),    # y resident across N tiles
                  pl.BlockSpec((TN, D_out), lambda j: (j, 0))],  # ob streamed / double-buffered, native layout
        out_specs=pl.BlockSpec((B, TN), lambda j: (0, j)),
        compiler_params=pltpu.CompilerParams(dimension_semantics=("parallel",),
                                             vmem_limit_bytes=32 << 20),
        cost_estimate=cost,
    )(y, ob_arr)
    return scores


def init_params(key, num_nodes, num_relations, embedding_dim, channels=50, kernel_size=3):
    D, C, K = embedding_dim, channels, kernel_size
    ks = jax.random.split(key, 6)
    node_emb = jax.random.normal(ks[0], (num_nodes + 1, D), jnp.float32)
    rel_emb = jax.random.normal(ks[1], (2 * num_relations + 1, D), jnp.float32)
    bound_c = 1.0 / math.sqrt(2 * K)
    conv_w = jax.random.uniform(ks[2], (C, 2, K), jnp.float32, -bound_c, bound_c)
    conv_b = jax.random.uniform(ks[3], (C,), jnp.float32, -bound_c, bound_c)
    bound_f = 1.0 / math.sqrt(D * C)
    fc_w = jax.random.uniform(ks[4], (D, D * C), jnp.float32, -bound_f, bound_f)
    fc_b = jax.random.uniform(ks[5], (D,), jnp.float32, -bound_f, bound_f)
    bn = lambda n: dict(gamma=jnp.ones((n,), jnp.float32), beta=jnp.zeros((n,), jnp.float32),
                        mean=jnp.zeros((n,), jnp.float32), var=jnp.ones((n,), jnp.float32))
    return dict(node_emb=node_emb, rel_emb=rel_emb, conv_w=conv_w, conv_b=conv_b,
                fc_w=fc_w, fc_b=fc_b, bn0=bn(2), bn1=bn(C), bn2=bn(D))


def simple_model_forward(params, num_nodes, t, timesteps_train, rels_per_node,
                         most_recent_in_graph_all, out_queries, H_tminus):
    """Simple_Model.forward (decoder_type='convtranse')."""
    s = params["node_emb"][out_queries[:, 0]]                    # node_embeddings(out_queries[:, 0])
    r = params["rel_emb"][out_queries[:, 1]]                     # relation_embeddings(out_queries[:, 1])
    H_t = H_tminus
    # o = node_embeddings(arange(num_nodes)): the embedding table is streamed directly by the
    # score kernel (rows [0, num_nodes)); no per-call gather / transpose / pad copy of N x D.
    scores_tplus = convtranse_decode(params, s, r, params["node_emb"], num_valid=num_nodes)
    return scores_tplus, H_t
    # TODO(synk): train-mode BatchNorm (batch statistics) is not implemented; eval-mode running
    # stats are used, and Dropout probabilities are 0 so dropout is identity. The reference's
    # literal `x.view(len(ob), -1)` only type-checks when len(sub) == len(ob); we use len(sub).


if __name__ == "__main__":
    num_nodes, num_relations, embedding_dim = 16, 4, 32
    batch = 8

    key = jax.random.PRNGKey(0)
    kq, kh, kp = jax.random.split(key, 3)
    params = init_params(kp, num_nodes, num_relations, embedding_dim,
                         channels=8, kernel_size=3)

    subs = jax.random.randint(kq, (batch,), 0, num_nodes)
    rels = jax.random.randint(jax.random.fold_in(kq, 1), (batch,), 0, 2 * num_relations)
    objs = jax.random.randint(jax.random.fold_in(kq, 2), (batch,), 0, num_nodes)
    out_queries = jnp.stack([subs, rels, objs], axis=1)          # [batch, 3]
    H_tminus = jax.random.normal(kh, (num_nodes, embedding_dim), jnp.float32)

    scores, H_t = simple_model_forward(
        params, num_nodes,
        t=0, timesteps_train=None, rels_per_node=None,
        most_recent_in_graph_all=None, out_queries=out_queries, H_tminus=H_tminus)

    jax.block_until_ready((scores, H_t))
    assert scores.shape == (batch, num_nodes) and scores.dtype == jnp.float32
    assert H_t.shape == H_tminus.shape
    print("KERNEL_OK")
</pallas_src>

<mosaic_0001>
module attributes {stable_mosaic.version = 11 : i64} {
  func.func @feature_kernel(%arg0: memref<4xf32, #tpu.memory_space<smem>>, %arg1: memref<56xf32, #tpu.memory_space<smem>>, %arg2: memref<8x32xf32, #tpu.memory_space<vmem>>, %arg3: memref<8x32xf32, #tpu.memory_space<vmem>>, %arg4: memref<256x32xbf16, #tpu.memory_space<vmem>>, %arg5: memref<1x32xf32, #tpu.memory_space<vmem>>, %arg6: memref<8x32xbf16, #tpu.memory_space<vmem>>, %arg7: memref<8x256xbf16, #tpu.memory_space<vmem>>) attributes {dimension_semantics = [], scalar_prefetch = 0 : i64, scratch_operands = 1 : i64, tpu.core_type = #tpu.core_type<tc>} {
    %c0 = arith.constant 0 : index
    %c0_0 = arith.constant 0 : index
    %0 = vector.load %arg2[%c0, %c0_0] : memref<8x32xf32, #tpu.memory_space<vmem>>, vector<8x32xf32>
    %1 = math.tanh %0 : vector<8x32xf32>
    %c0_1 = arith.constant 0 : index
    %2 = memref.load %arg0[%c0_1] : memref<4xf32, #tpu.memory_space<smem>>
    %3 = vector.broadcast %2 : f32 to vector<8x32xf32>
    %4 = arith.mulf %1, %3 : vector<8x32xf32>
    %c1 = arith.constant 1 : index
    %5 = memref.load %arg0[%c1] : memref<4xf32, #tpu.memory_space<smem>>
    %6 = vector.broadcast %5 : f32 to vector<8x32xf32>
    %7 = arith.addf %4, %6 : vector<8x32xf32>
    %c0_2 = arith.constant 0 : index
    %c0_3 = arith.constant 0 : index
    %8 = vector.load %arg3[%c0_2, %c0_3] : memref<8x32xf32, #tpu.memory_space<vmem>>, vector<8x32xf32>
    %c2 = arith.constant 2 : index
    %9 = memref.load %arg0[%c2] : memref<4xf32, #tpu.memory_space<smem>>
    %10 = vector.broadcast %9 : f32 to vector<8x32xf32>
    %11 = arith.mulf %8, %10 : vector<8x32xf32>
    %c3 = arith.constant 3 : index
    %12 = memref.load %arg0[%c3] : memref<4xf32, #tpu.memory_space<smem>>
    %13 = vector.broadcast %12 : f32 to vector<8x32xf32>
    %14 = arith.addf %11, %13 : vector<8x32xf32>
    %15 = tpu.iota {dimensions = array<i32: 1>} : vector<8x32xi32>
    %c1_i32 = arith.constant 1 : i32
    %16 = tpu.dynamic_rotate %7 by %c1_i32 dim 1 : vector<8x32xf32>, i32 -> vector<8x32xf32>
    %c1_i32_4 = arith.constant 1 : i32
    %17 = vector.broadcast %c1_i32_4 : i32 to vector<8x32xi32>
    %18 = arith.cmpi slt, %15, %17 : vector<8x32xi32>
    %cst = arith.constant 0.000000e+00 : f32
    %19 = vector.broadcast %cst : f32 to vector<8x32xf32>
    %20 = arith.select %18, %19, %16 : vector<8x32xi1>, vector<8x32xf32>
    %c31_i32 = arith.constant 31 : i32
    %21 = tpu.dynamic_rotate %7 by %c31_i32 dim 1 : vector<8x32xf32>, i32 -> vector<8x32xf32>
    %c31_i32_5 = arith.constant 31 : i32
    %22 = vector.broadcast %c31_i32_5 : i32 to vector<8x32xi32>
    %23 = arith.cmpi sge, %15, %22 : vector<8x32xi32>
    %cst_6 = arith.constant 0.000000e+00 : f32
    %24 = vector.broadcast %cst_6 : f32 to vector<8x32xf32>
    %25 = arith.select %23, %24, %21 : vector<8x32xi1>, vector<8x32xf32>
    %c1_i32_7 = arith.constant 1 : i32
    %26 = tpu.dynamic_rotate %14 by %c1_i32_7 dim 1 : vector<8x32xf32>, i32 -> vector<8x32xf32>
    %c1_i32_8 = arith.constant 1 : i32
    %27 = vector.broadcast %c1_i32_8 : i32 to vector<8x32xi32>
    %28 = arith.cmpi slt, %15, %27 : vector<8x32xi32>
    %cst_9 = arith.constant 0.000000e+00 : f32
    %29 = vector.broadcast %cst_9 : f32 to vector<8x32xf32>
    %30 = arith.select %28, %29, %26 : vector<8x32xi1>, vector<8x32xf32>
    %c31_i32_10 = arith.constant 31 : i32
    %31 = tpu.dynamic_rotate %14 by %c31_i32_10 dim 1 : vector<8x32xf32>, i32 -> vector<8x32xf32>
    %c31_i32_11 = arith.constant 31 : i32
    %32 = vector.broadcast %c31_i32_11 : i32 to vector<8x32xi32>
    %33 = arith.cmpi sge, %15, %32 : vector<8x32xi32>
    %cst_12 = arith.constant 0.000000e+00 : f32
    %34 = vector.broadcast %cst_12 : f32 to vector<8x32xf32>
    %35 = arith.select %33, %34, %31 : vector<8x32xi1>, vector<8x32xf32>
    %c0_13 = arith.constant 0 : index
    %36 = memref.load %arg1[%c0_13] : memref<56xf32, #tpu.memory_space<smem>>
    %37 = vector.broadcast %36 : f32 to vector<8x32xf32>
    %38 = arith.mulf %37, %20 : vector<8x32xf32>
    %c3_14 = arith.constant 3 : index
    %39 = memref.load %arg1[%c3_14] : memref<56xf32, #tpu.memory_space<smem>>
    %40 = vector.broadcast %39 : f32 to vector<8x32xf32>
    %41 = arith.mulf %40, %30 : vector<8x32xf32>
    %42 = arith.addf %38, %41 : vector<8x32xf32>
    %c1_15 = arith.constant 1 : index
    %43 = memref.load %arg1[%c1_15] : memref<56xf32, #tpu.memory_space<smem>>
    %44 = vector.broadcast %43 : f32 to vector<8x32xf32>
    %45 = arith.mulf %44, %7 : vector<8x32xf32>
    %46 = arith.addf %42, %45 : vector<8x32xf32>
    %c4 = arith.constant 4 : index
    %47 = memref.load %arg1[%c4] : memref<56xf32, #tpu.memory_space<smem>>
    %48 = vector.broadcast %47 : f32 to vector<8x32xf32>
    %49 = arith.mulf %48, %14 : vector<8x32xf32>
    %50 = arith.addf %46, %49 : vector<8x32xf32>
    %c2_16 = arith.constant 2 : index
    %51 = memref.load %arg1[%c2_16] : memref<56xf32, #tpu.memory_space<smem>>
    %52 = vector.broadcast %51 : f32 to vector<8x32xf32>
    %53 = arith.mulf %52, %25 : vector<8x32xf32>
    %54 = arith.addf %50, %53 : vector<8x32xf32>
    %c5 = arith.constant 5 : index
    %55 = memref.load %arg1[%c5] : memref<56xf32, #tpu.memory_space<smem>>
    %56 = vector.broadcast %55 : f32 to vector<8x32xf32>
    %57 = arith.mulf %56, %35 : vector<8x32xf32>
    %58 = arith.addf %54, %57 : vector<8x32xf32>
    %c6 = arith.constant 6 : index
    %59 = memref.load %arg1[%c6] : memref<56xf32, #tpu.memory_space<smem>>
    %60 = vector.broadcast %59 : f32 to vector<8x32xf32>
    %61 = arith.addf %58, %60 : vector<8x32xf32>
    %cst_17 = arith.constant 0.000000e+00 : f32
    %62 = vector.broadcast %cst_17 : f32 to vector<8x32xf32>
    %63 = arith.maximumf %61, %62 : vector<8x32xf32>
    %64 = arith.truncf %63 : vector<8x32xf32> to vector<8x32xbf16>
    %c0_18 = arith.constant 0 : index
    %c0_19 = arith.constant 0 : index
    %65 = vector.load %arg7[%c0_18, %c0_19] : memref<8x256xbf16, #tpu.memory_space<vmem>>, vector<8x32xbf16>
    tpu.vector_store %arg7[%c0_18, %c0_19], %64 {strides = array<i32>} : memref<8x256xbf16, #tpu.memory_space<vmem>>, vector<8x32xbf16>,
    %c7 = arith.constant 7 : index
    %66 = memref.load %arg1[%c7] : memref<56xf32, #tpu.memory_space<smem>>
    %67 = vector.broadcast %66 : f32 to vector<8x32xf32>
    %68 = arith.mulf %67, %20 : vector<8x32xf32>
    %c10 = arith.constant 10 : index
    %69 = memref.load %arg1[%c10] : memref<56xf32, #tpu.memory_space<smem>>
    %70 = vector.broadcast %69 : f32 to vector<8x32xf32>
    %71 = arith.mulf %70, %30 : vector<8x32xf32>
    %72 = arith.addf %68, %71 : vector<8x32xf32>
    %c8 = arith.constant 8 : index
    %73 = memref.load %arg1[%c8] : memref<56xf32, #tpu.memory_space<smem>>
    %74 = vector.broadcast %73 : f32 to vector<8x32xf32>
    %75 = arith.mulf %74, %7 : vector<8x32xf32>
    %76 = arith.addf %72, %75 : vector<8x32xf32>
    %c11 = arith.constant 11 : index
    %77 = memref.load %arg1[%c11] : memref<56xf32, #tpu.memory_space<smem>>
    %78 = vector.broadcast %77 : f32 to vector<8x32xf32>
    %79 = arith.mulf %78, %14 : vector<8x32xf32>
    %80 = arith.addf %76, %79 : vector<8x32xf32>
    %c9 = arith.constant 9 : index
    %81 = memref.load %arg1[%c9] : memref<56xf32, #tpu.memory_space<smem>>
    %82 = vector.broadcast %81 : f32 to vector<8x32xf32>
    %83 = arith.mulf %82, %25 : vector<8x32xf32>
    %84 = arith.addf %80, %83 : vector<8x32xf32>
    %c12 = arith.constant 12 : index
    %85 = memref.load %arg1[%c12] : memref<56xf32, #tpu.memory_space<smem>>
    %86 = vector.broadcast %85 : f32 to vector<8x32xf32>
    %87 = arith.mulf %86, %35 : vector<8x32xf32>
    %88 = arith.addf %84, %87 : vector<8x32xf32>
    %c13 = arith.constant 13 : index
    %89 = memref.load %arg1[%c13] : memref<56xf32, #tpu.memory_space<smem>>
    %90 = vector.broadcast %89 : f32 to vector<8x32xf32>
    %91 = arith.addf %88, %90 : vector<8x32xf32>
    %cst_20 = arith.constant 0.000000e+00 : f32
    %92 = vector.broadcast %cst_20 : f32 to vector<8x32xf32>
    %93 = arith.maximumf %91, %92 : vector<8x32xf32>
    %94 = arith.truncf %93 : vector<8x32xf32> to vector<8x32xbf16>
    %c0_21 = arith.constant 0 : index
    %c32 = arith.constant 32 : index
    %95 = vector.load %arg7[%c0_21, %c32] : memref<8x256xbf16, #tpu.memory_space<vmem>>, vector<8x32xbf16>
    tpu.vector_store %arg7[%c0_21, %c32], %94 {strides = array<i32>} : memref<8x256xbf16, #tpu.memory_space<vmem>>, vector<8x32xbf16>,
    %c14 = arith.constant 14 : index
    %96 = memref.load %arg1[%c14] : memref<56xf32, #tpu.memory_space<smem>>
    %97 = vector.broadcast %96 : f32 to vector<8x32xf32>
    %98 = arith.mulf %97, %20 : vector<8x32xf32>
    %c17 = arith.constant 17 : index
    %99 = memref.load %arg1[%c17] : memref<56xf32, #tpu.memory_space<smem>>
    %100 = vector.broadcast %99 : f32 to vector<8x32xf32>
    %101 = arith.mulf %100, %30 : vector<8x32xf32>
    %102 = arith.addf %98, %101 : vector<8x32xf32>
    %c15 = arith.constant 15 : index
    %103 = memref.load %arg1[%c15] : memref<56xf32, #tpu.memory_space<smem>>
    %104 = vector.broadcast %103 : f32 to vector<8x32xf32>
    %105 = arith.mulf %104, %7 : vector<8x32xf32>
    %106 = arith.addf %102, %105 : vector<8x32xf32>
    %c18 = arith.constant 18 : index
    %107 = memref.load %arg1[%c18] : memref<56xf32, #tpu.memory_space<smem>>
    %108 = vector.broadcast %107 : f32 to vector<8x32xf32>
    %109 = arith.mulf %108, %14 : vector<8x32xf32>
    %110 = arith.addf %106, %109 : vector<8x32xf32>
    %c16 = arith.constant 16 : index
    %111 = memref.load %arg1[%c16] : memref<56xf32, #tpu.memory_space<smem>>
    %112 = vector.broadcast %111 : f32 to vector<8x32xf32>
    %113 = arith.mulf %112, %25 : vector<8x32xf32>
    %114 = arith.addf %110, %113 : vector<8x32xf32>
    %c19 = arith.constant 19 : index
    %115 = memref.load %arg1[%c19] : memref<56xf32, #tpu.memory_space<smem>>
    %116 = vector.broadcast %115 : f32 to vector<8x32xf32>
    %117 = arith.mulf %116, %35 : vector<8x32xf32>
    %118 = arith.addf %114, %117 : vector<8x32xf32>
    %c20 = arith.constant 20 : index
    %119 = memref.load %arg1[%c20] : memref<56xf32, #tpu.memory_space<smem>>
    %120 = vector.broadcast %119 : f32 to vector<8x32xf32>
    %121 = arith.addf %118, %120 : vector<8x32xf32>
    %cst_22 = arith.constant 0.000000e+00 : f32
    %122 = vector.broadcast %cst_22 : f32 to vector<8x32xf32>
    %123 = arith.maximumf %121, %122 : vector<8x32xf32>
    %124 = arith.truncf %123 : vector<8x32xf32> to vector<8x32xbf16>
    %c0_23 = arith.constant 0 : index
    %c64 = arith.constant 64 : index
    %125 = vector.load %arg7[%c0_23, %c64] : memref<8x256xbf16, #tpu.memory_space<vmem>>, vector<8x32xbf16>
    tpu.vector_store %arg7[%c0_23, %c64], %124 {strides = array<i32>} : memref<8x256xbf16, #tpu.memory_space<vmem>>, vector<8x32xbf16>,
    %c21 = arith.constant 21 : index
    %126 = memref.load %arg1[%c21] : memref<56xf32, #tpu.memory_space<smem>>
    %127 = vector.broadcast %126 : f32 to vector<8x32xf32>
    %128 = arith.mulf %127, %20 : vector<8x32xf32>
    %c24 = arith.constant 24 : index
    %129 = memref.load %arg1[%c24] : memref<56xf32, #tpu.memory_space<smem>>
    %130 = vector.broadcast %129 : f32 to vector<8x32xf32>
    %131 = arith.mulf %130, %30 : vector<8x32xf32>
    %132 = arith.addf %128, %131 : vector<8x32xf32>
    %c22 = arith.constant 22 : index
    %133 = memref.load %arg1[%c22] : memref<56xf32, #tpu.memory_space<smem>>
    %134 = vector.broadcast %133 : f32 to vector<8x32xf32>
    %135 = arith.mulf %134, %7 : vector<8x32xf32>
    %136 = arith.addf %132, %135 : vector<8x32xf32>
    %c25 = arith.constant 25 : index
    %137 = memref.load %arg1[%c25] : memref<56xf32, #tpu.memory_space<smem>>
    %138 = vector.broadcast %137 : f32 to vector<8x32xf32>
    %139 = arith.mulf %138, %14 : vector<8x32xf32>
    %140 = arith.addf %136, %139 : vector<8x32xf32>
    %c23 = arith.constant 23 : index
    %141 = memref.load %arg1[%c23] : memref<56xf32, #tpu.memory_space<smem>>
    %142 = vector.broadcast %141 : f32 to vector<8x32xf32>
    %143 = arith.mulf %142, %25 : vector<8x32xf32>
    %144 = arith.addf %140, %143 : vector<8x32xf32>
    %c26 = arith.constant 26 : index
    %145 = memref.load %arg1[%c26] : memref<56xf32, #tpu.memory_space<smem>>
    %146 = vector.broadcast %145 : f32 to vector<8x32xf32>
    %147 = arith.mulf %146, %35 : vector<8x32xf32>
    %148 = arith.addf %144, %147 : vector<8x32xf32>
    %c27 = arith.constant 27 : index
    %149 = memref.load %arg1[%c27] : memref<56xf32, #tpu.memory_space<smem>>
    %150 = vector.broadcast %149 : f32 to vector<8x32xf32>
    %151 = arith.addf %148, %150 : vector<8x32xf32>
    %cst_24 = arith.constant 0.000000e+00 : f32
    %152 = vector.broadcast %cst_24 : f32 to vector<8x32xf32>
    %153 = arith.maximumf %151, %152 : vector<8x32xf32>
    %154 = arith.truncf %153 : vector<8x32xf32> to vector<8x32xbf16>
    %c0_25 = arith.constant 0 : index
    %c96 = arith.constant 96 : index
    %155 = vector.load %arg7[%c0_25, %c96] : memref<8x256xbf16, #tpu.memory_space<vmem>>, vector<8x32xbf16>
    tpu.vector_store %arg7[%c0_25, %c96], %154 {strides = array<i32>} : memref<8x256xbf16, #tpu.memory_space<vmem>>, vector<8x32xbf16>,
    %c28 = arith.constant 28 : index
    %156 = memref.load %arg1[%c28] : memref<56xf32, #tpu.memory_space<smem>>
    %157 = vector.broadcast %156 : f32 to vector<8x32xf32>
    %158 = arith.mulf %157, %20 : vector<8x32xf32>
    %c31 = arith.constant 31 : index
    %159 = memref.load %arg1[%c31] : memref<56xf32, #tpu.memory_space<smem>>
    %160 = vector.broadcast %159 : f32 to vector<8x32xf32>
    %161 = arith.mulf %160, %30 : vector<8x32xf32>
    %162 = arith.addf %158, %161 : vector<8x32xf32>
    %c29 = arith.constant 29 : index
    %163 = memref.load %arg1[%c29] : memref<56xf32, #tpu.memory_space<smem>>
    %164 = vector.broadcast %163 : f32 to vector<8x32xf32>
    %165 = arith.mulf %164, %7 : vector<8x32xf32>
    %166 = arith.addf %162, %165 : vector<8x32xf32>
    %c32_26 = arith.constant 32 : index
    %167 = memref.load %arg1[%c32_26] : memref<56xf32, #tpu.memory_space<smem>>
    %168 = vector.broadcast %167 : f32 to vector<8x32xf32>
    %169 = arith.mulf %168, %14 : vector<8x32xf32>
    %170 = arith.addf %166, %169 : vector<8x32xf32>
    %c30 = arith.constant 30 : index
    %171 = memref.load %arg1[%c30] : memref<56xf32, #tpu.memory_space<smem>>
    %172 = vector.broadcast %171 : f32 to vector<8x32xf32>
    %173 = arith.mulf %172, %25 : vector<8x32xf32>
    %174 = arith.addf %170, %173 : vector<8x32xf32>
    %c33 = arith.constant 33 : index
    %175 = memref.load %arg1[%c33] : memref<56xf32, #tpu.memory_space<smem>>
    %176 = vector.broadcast %175 : f32 to vector<8x32xf32>
    %177 = arith.mulf %176, %35 : vector<8x32xf32>
    %178 = arith.addf %174, %177 : vector<8x32xf32>
    %c34 = arith.constant 34 : index
    %179 = memref.load %arg1[%c34] : memref<56xf32, #tpu.memory_space<smem>>
    %180 = vector.broadcast %179 : f32 to vector<8x32xf32>
    %181 = arith.addf %178, %180 : vector<8x32xf32>
    %cst_27 = arith.constant 0.000000e+00 : f32
    %182 = vector.broadcast %cst_27 : f32 to vector<8x32xf32>
    %183 = arith.maximumf %181, %182 : vector<8x32xf32>
    %184 = arith.truncf %183 : vector<8x32xf32> to vector<8x32xbf16>
    %c0_28 = arith.constant 0 : index
    %c128 = arith.constant 128 : index
    %185 = vector.load %arg7[%c0_28, %c128] : memref<8x256xbf16, #tpu.memory_space<vmem>>, vector<8x32xbf16>
    tpu.vector_store %arg7[%c0_28, %c128], %184 {strides = array<i32>} : memref<8x256xbf16, #tpu.memory_space<vmem>>, vector<8x32xbf16>,
    %c35 = arith.constant 35 : index
    %186 = memref.load %arg1[%c35] : memref<56xf32, #tpu.memory_space<smem>>
    %187 = vector.broadcast %186 : f32 to vector<8x32xf32>
    %188 = arith.mulf %187, %20 : vector<8x32xf32>
    %c38 = arith.constant 38 : index
    %189 = memref.load %arg1[%c38] : memref<56xf32, #tpu.memory_space<smem>>
    %190 = vector.broadcast %189 : f32 to vector<8x32xf32>
    %191 = arith.mulf %190, %30 : vector<8x32xf32>
    %192 = arith.addf %188, %191 : vector<8x32xf32>
    %c36 = arith.constant 36 : index
    %193 = memref.load %arg1[%c36] : memref<56xf32, #tpu.memory_space<smem>>
    %194 = vector.broadcast %193 : f32 to vector<8x32xf32>
    %195 = arith.mulf %194, %7 : vector<8x32xf32>
    %196 = arith.addf %192, %195 : vector<8x32xf32>
    %c39 = arith.constant 39 : index
    %197 = memref.load %arg1[%c39] : memref<56xf32, #tpu.memory_space<smem>>
    %198 = vector.broadcast %197 : f32 to vector<8x32xf32>
    %199 = arith.mulf %198, %14 : vector<8x32xf32>
    %200 = arith.addf %196, %199 : vector<8x32xf32>
    %c37 = arith.constant 37 : index
    %201 = memref.load %arg1[%c37] : memref<56xf32, #tpu.memory_space<smem>>
    %202 = vector.broadcast %201 : f32 to vector<8x32xf32>
    %203 = arith.mulf %202, %25 : vector<8x32xf32>
    %204 = arith.addf %200, %203 : vector<8x32xf32>
    %c40 = arith.constant 40 : index
    %205 = memref.load %arg1[%c40] : memref<56xf32, #tpu.memory_space<smem>>
    %206 = vector.broadcast %205 : f32 to vector<8x32xf32>
    %207 = arith.mulf %206, %35 : vector<8x32xf32>
    %208 = arith.addf %204, %207 : vector<8x32xf32>
    %c41 = arith.constant 41 : index
    %209 = memref.load %arg1[%c41] : memref<56xf32, #tpu.memory_space<smem>>
    %210 = vector.broadcast %209 : f32 to vector<8x32xf32>
    %211 = arith.addf %208, %210 : vector<8x32xf32>
    %cst_29 = arith.constant 0.000000e+00 : f32
    %212 = vector.broadcast %cst_29 : f32 to vector<8x32xf32>
    %213 = arith.maximumf %211, %212 : vector<8x32xf32>
    %214 = arith.truncf %213 : vector<8x32xf32> to vector<8x32xbf16>
    %c0_30 = arith.constant 0 : index
    %c160 = arith.constant 160 : index
    %215 = vector.load %arg7[%c0_30, %c160] : memref<8x256xbf16, #tpu.memory_space<vmem>>, vector<8x32xbf16>
    tpu.vector_store %arg7[%c0_30, %c160], %214 {strides = array<i32>} : memref<8x256xbf16, #tpu.memory_space<vmem>>, vector<8x32xbf16>,
    %c42 = arith.constant 42 : index
    %216 = memref.load %arg1[%c42] : memref<56xf32, #tpu.memory_space<smem>>
    %217 = vector.broadcast %216 : f32 to vector<8x32xf32>
    %218 = arith.mulf %217, %20 : vector<8x32xf32>
    %c45 = arith.constant 45 : index
    %219 = memref.load %arg1[%c45] : memref<56xf32, #tpu.memory_space<smem>>
    %220 = vector.broadcast %219 : f32 to vector<8x32xf32>
    %221 = arith.mulf %220, %30 : vector<8x32xf32>
    %222 = arith.addf %218, %221 : vector<8x32xf32>
    %c43 = arith.constant 43 : index
    %223 = memref.load %arg1[%c43] : memref<56xf32, #tpu.memory_space<smem>>
    %224 = vector.broadcast %223 : f32 to vector<8x32xf32>
    %225 = arith.mulf %224, %7 : vector<8x32xf32>
    %226 = arith.addf %222, %225 : vector<8x32xf32>
    %c46 = arith.constant 46 : index
    %227 = memref.load %arg1[%c46] : memref<56xf32, #tpu.memory_space<smem>>
    %228 = vector.broadcast %227 : f32 to vector<8x32xf32>
    %229 = arith.mulf %228, %14 : vector<8x32xf32>
    %230 = arith.addf %226, %229 : vector<8x32xf32>
    %c44 = arith.constant 44 : index
    %231 = memref.load %arg1[%c44] : memref<56xf32, #tpu.memory_space<smem>>
    %232 = vector.broadcast %231 : f32 to vector<8x32xf32>
    %233 = arith.mulf %232, %25 : vector<8x32xf32>
    %234 = arith.addf %230, %233 : vector<8x32xf32>
    %c47 = arith.constant 47 : index
    %235 = memref.load %arg1[%c47] : memref<56xf32, #tpu.memory_space<smem>>
    %236 = vector.broadcast %235 : f32 to vector<8x32xf32>
    %237 = arith.mulf %236, %35 : vector<8x32xf32>
    %238 = arith.addf %234, %237 : vector<8x32xf32>
    %c48 = arith.constant 48 : index
    %239 = memref.load %arg1[%c48] : memref<56xf32, #tpu.memory_space<smem>>
    %240 = vector.broadcast %239 : f32 to vector<8x32xf32>
    %241 = arith.addf %238, %240 : vector<8x32xf32>
    %cst_31 = arith.constant 0.000000e+00 : f32
    %242 = vector.broadcast %cst_31 : f32 to vector<8x32xf32>
    %243 = arith.maximumf %241, %242 : vector<8x32xf32>
    %244 = arith.truncf %243 : vector<8x32xf32> to vector<8x32xbf16>
    %c0_32 = arith.constant 0 : index
    %c192 = arith.constant 192 : index
    %245 = vector.load %arg7[%c0_32, %c192] : memref<8x256xbf16, #tpu.memory_space<vmem>>, vector<8x32xbf16>
    tpu.vector_store %arg7[%c0_32, %c192], %244 {strides = array<i32>} : memref<8x256xbf16, #tpu.memory_space<vmem>>, vector<8x32xbf16>,
    %c49 = arith.constant 49 : index
    %246 = memref.load %arg1[%c49] : memref<56xf32, #tpu.memory_space<smem>>
    %247 = vector.broadcast %246 : f32 to vector<8x32xf32>
    %248 = arith.mulf %247, %20 : vector<8x32xf32>
    %c52 = arith.constant 52 : index
    %249 = memref.load %arg1[%c52] : memref<56xf32, #tpu.memory_space<smem>>
    %250 = vector.broadcast %249 : f32 to vector<8x32xf32>
    %251 = arith.mulf %250, %30 : vector<8x32xf32>
    %252 = arith.addf %248, %251 : vector<8x32xf32>
    %c50 = arith.constant 50 : index
    %253 = memref.load %arg1[%c50] : memref<56xf32, #tpu.memory_space<smem>>
    %254 = vector.broadcast %253 : f32 to vector<8x32xf32>
    %255 = arith.mulf %254, %7 : vector<8x32xf32>
    %256 = arith.addf %252, %255 : vector<8x32xf32>
    %c53 = arith.constant 53 : index
    %257 = memref.load %arg1[%c53] : memref<56xf32, #tpu.memory_space<smem>>
    %258 = vector.broadcast %257 : f32 to vector<8x32xf32>
    %259 = arith.mulf %258, %14 : vector<8x32xf32>
    %260 = arith.addf %256, %259 : vector<8x32xf32>
    %c51 = arith.constant 51 : index
    %261 = memref.load %arg1[%c51] : memref<56xf32, #tpu.memory_space<smem>>
    %262 = vector.broadcast %261 : f32 to vector<8x32xf32>
    %263 = arith.mulf %262, %25 : vector<8x32xf32>
    %264 = arith.addf %260, %263 : vector<8x32xf32>
    %c54 = arith.constant 54 : index
    %265 = memref.load %arg1[%c54] : memref<56xf32, #tpu.memory_space<smem>>
    %266 = vector.broadcast %265 : f32 to vector<8x32xf32>
    %267 = arith.mulf %266, %35 : vector<8x32xf32>
    %268 = arith.addf %264, %267 : vector<8x32xf32>
    %c55 = arith.constant 55 : index
    %269 = memref.load %arg1[%c55] : memref<56xf32, #tpu.memory_space<smem>>
    %270 = vector.broadcast %269 : f32 to vector<8x32xf32>
    %271 = arith.addf %268, %270 : vector<8x32xf32>
    %cst_33 = arith.constant 0.000000e+00 : f32
    %272 = vector.broadcast %cst_33 : f32 to vector<8x32xf32>
    %273 = arith.maximumf %271, %272 : vector<8x32xf32>
    %274 = arith.truncf %273 : vector<8x32xf32> to vector<8x32xbf16>
    %c0_34 = arith.constant 0 : index
    %c224 = arith.constant 224 : index
    %275 = vector.load %arg7[%c0_34, %c224] : memref<8x256xbf16, #tpu.memory_space<vmem>>, vector<8x32xbf16>
    tpu.vector_store %arg7[%c0_34, %c224], %274 {strides = array<i32>} : memref<8x256xbf16, #tpu.memory_space<vmem>>, vector<8x32xbf16>,
    %c0_35 = arith.constant 0 : index
    %c0_36 = arith.constant 0 : index
    %276 = vector.load %arg7[%c0_35, %c0_36] : memref<8x256xbf16, #tpu.memory_space<vmem>>, vector<8x256xbf16>
    %c0_37 = arith.constant 0 : index
    %c0_38 = arith.constant 0 : index
    %277 = vector.load %arg4[%c0_37, %c0_38] : memref<256x32xbf16, #tpu.memory_space<vmem>>, vector<256x32xbf16>
    %cst_39 = arith.constant dense<0.000000e+00> : vector<8x32xf32>
    %278 = tpu.matmul %276, %277, %cst_39 {dimension_numbers = #tpu.dot_dimension_numbers<[1], [0], [0], [1], [0, 0, 1, 1], [], []>} : vector<8x256xbf16>, vector<256x32xbf16>, vector<8x32xf32> -> vector<8x32xf32>
    %c0_40 = arith.constant 0 : index
    %c0_41 = arith.constant 0 : index
    %279 = vector.load %arg5[%c0_40, %c0_41] : memref<1x32xf32, #tpu.memory_space<vmem>>, vector<1x32xf32>
    %280 = vector.broadcast %279 : vector<1x32xf32> to vector<8x32xf32>
    %281 = arith.addf %278, %280 : vector<8x32xf32>
    %cst_42 = arith.constant 0.000000e+00 : f32
    %282 = vector.broadcast %cst_42 : f32 to vector<8x32xf32>
    %283 = arith.maximumf %281, %282 : vector<8x32xf32>
    %284 = arith.truncf %283 : vector<8x32xf32> to vector<8x32xbf16>
    %c0_43 = arith.constant 0 : index
    %c0_44 = arith.constant 0 : index
    %285 = vector.load %arg6[%c0_43, %c0_44] : memref<8x32xbf16, #tpu.memory_space<vmem>>, vector<8x32xbf16>
    tpu.vector_store %arg6[%c0_43, %c0_44], %284 {strides = array<i32>} : memref<8x32xbf16, #tpu.memory_space<vmem>>, vector<8x32xbf16>,
    return
  }
}

</mosaic_0001>

<bundles_post_ra>
// kernel: tpu_custom_call.1
= control target key start
LH: loop header
LB: loop body
LE: loop exit
PB: predicated region body
PF: predicated region fallthrough
CT: control target
= control target key end

     0   :  { %s1233_s0 = inlined_call_operand.vmem [shape: f32[4], index: 0, kind: input, shape index: {}]   ;;  %s1234_s1 = inlined_call_operand.vmem [shape: f32[56], index: 1, kind: input, shape index: {}]   ;;  %s1235_s2 = inlined_call_operand.vmem [shape: f32[8,32], index: 2, kind: input, shape index: {}]   ;;  %s1236_s3 = inlined_call_operand.vmem [shape: f32[8,32], index: 3, kind: input, shape index: {}]   ;;  %s1237_s4 = inlined_call_operand.vmem [shape: bf16[256,32], index: 4, kind: input, shape index: {}]   ;;  %s1238_s5 = inlined_call_operand.vmem [shape: f32[1,32], index: 5, kind: input, shape index: {}]   ;;  %s1239_s6 = inlined_call_operand.hbm [shape: bf16[8,32], index: 6, kind: output, shape index: {}]  }
   0x1   :  { %1269 = sst [smem:[#allocation37_spill]] %s1237_s4 }
   0x2   :  { %1270 = sst [smem:[#allocation38_spill]] %s1238_s5 }
   0x3   :  { %1271 = sst [smem:[#allocation39_spill]] %s1239_s6 }
   0x4   :  { %11 = vsyncpa [#allocation5], 0 }
   0x5   :  { %12 = vsyncpa [#allocation7], 0 }
   0x6   :  { %13 = vsyncpa [#allocation4], 0  ;;  %s20_s23 = sshll.u32 %s1233_s0, 4  ;;  %s30_s26 = sshll.u32 %s1234_s1, 4  ;;  %s21_s23 = int_to_ptr.vmem [resolvable:$true] %s20_s23  ;;  %s31_s26 = int_to_ptr.vmem [resolvable:$true] %s30_s26 }
   0x7   :  { %s713_s27 = scalar_lea.vmem %s21_s23, 16  ;;  %p718_p1 = scmp.lt.s32.totalorder %s21_s23, %s21_s23 }
   0x8   :  { %p714_p0 = scmp.ne.s32.totalorder %s21_s23, %s713_s27  ;;  %p719_p2 = scmp.lt.s32.totalorder %s713_s27, %s713_s27 }
   0xa   :  { %p720_p3 = por %p719_p2, %p718_p1 }
   0xc   :  { %p721_p4 = pnand %p720_p3, %p714_p0 }
   0xe   :  { %724 = shalt.err (!%p721_p4)
}
   0xf   :  { %s763_s28 = smov [#allocation3]   ;;  %s725_s29 = scalar_lea.vmem %s31_s26, 16 }
  0x10   :  { %23 = dma.vmem_to_smem %s21_s23, 16, %s763_s28, [#allocation5]  }
  0x11   :  { %p726_p5 = scmp.ne.s32.totalorder %s31_s26, %s725_s29  ;;  %p730_p6 = scmp.lt.s32.totalorder %s31_s26, %s31_s26 }
  0x12   :  { %p731_p7 = scmp.lt.s32.totalorder %s725_s29, %s725_s29 }
  0x14   :  { %p732_p8 = por %p731_p7, %p730_p6 }
  0x16   :  { %p733_p9 = pnand %p732_p8, %p726_p5 }
  0x18   :  { %736 = shalt.err (!%p733_p9)
}
  0x19   :  { %s764_s0 = smov [#allocation6]  }
  0x1a   :  { %33 = dma.vmem_to_smem %s31_s26, 16, %s764_s0, [#allocation7]  }
  0x1b   :  { %757 = dma.done.wait [#allocation5], 16  }
  0x1c   :  { %758 = vsyncadd [#allocation5], 4294967280 }
  0x1d   :  { %759 = dma.done.wait [#allocation7], 16  }
  0x1e   :  { %760 = vsyncadd [#allocation7], 4294967280 }
  0x1f   :  { %48 = sfence }
  0x20   :  { %v50_v0 = vld [vmem:[%s1235_s2] sm:$0xff]  ;;  %s52_s7 = sld [smem:[#allocation3]]  ;;  %s1240_s13 = smov 32   ;;  %vm67_vm0 = vcmask 1047808   ;;  %v693_v19 = vld [vmem:[%s1237_s4 + $0x78] sm:$0xff]   ;;  %v695_v21 = vld [vmem:[%s1237_s4 + $0x70] sm:$0xff]   ;;  %v65_v26 = vlaneseq }
  0x21   :  { %711 = vtanh.f32 %v50_v0  ;;  %s574_s8 = sld [smem:[#allocation3 + $0x1]]  ;;  %v58_v1 = vld [vmem:[%s1236_s3] sm:$0xff]  ;;  %s766_s2 = smov 97   ;;  %v694_v20 = vld [vmem:[%s1237_s4 + $0x38] sm:$0xff]   ;;  %663 = vmatprep.subr.bf16.mxu0 %v693_v19  ;;  %v696_v22 = vld [vmem:[%s1237_s4 + $0x30] sm:$0xff]   ;;  %vm128_vm3 = vcmask 257024  }
  0x22   :  { %s575_s9 = sld [smem:[#allocation3 + $0x2]]  ;;  %s767_s3 = smov 127   ;;  %664 = vmatpush3.bf16.msra.mxu0 %v694_v20  ;;  %v697_v23 = vld [vmem:[%s1237_s4 + $0x68] sm:$0xff]   ;;  %v699_v25 = vld [vmem:[%s1237_s4 + $0x60] sm:$0xff]   ;;  %v937_v27 = vand.u32 127, %v65_v26  ;;  %vm164_vm4 = vcmask 519424  }
  0x23   :  { %s576_s10 = sld [smem:[#allocation3 + $0x3]]  ;;  %665 = vmatprep.subr.bf16.mxu0 %v695_v21  ;;  %v698_v24 = vld [vmem:[%s1237_s4 + $0x28] sm:$0xff]   ;;  %vm200_vm5 = vcmask 781824   ;;  %vm236_vm6 = vcmask 1044224  }
  0x24   :  { %s853_s28 = sld [smem:[#allocation6]]  ;;  %vm74_vm1 = vcmp.lt.s32.totalorder %v937_v27, 1  ;;  %vm80_vm2 = vcmp.ge.s32.totalorder %v937_v27, 31 }
  0x25   :  { %s855_s29 = sld [smem:[#allocation6 + $0x7]] }
  0x26   :  { %v53_v2 = vstv %s52_s7  ;;  %666 = vmatpush3.bf16.msra.mxu0 %v696_v22  ;;  %s857_s0 = sld [smem:[#allocation6 + $0xe]] }
  0x27   :  { %v56_v5 = vstv %s574_s8  ;;  %667 = vmatprep.subr.bf16.mxu0 %v697_v23  ;;  %s859_s1 = sld [smem:[#allocation6 + $0x15]] }
  0x28   :  { %v60_v3 = vstv %s575_s9  ;;  %s861_s30 = sld [smem:[#allocation6 + $0x1c]] }
  0x29   :  { %v61_v7 = vmul.f32 %v60_v3, %v58_v1  ;;  %v63_v8 = vstv %s576_s10  ;;  %s863_s7 = sld [smem:[#allocation6 + $0x23]] }
  0x2a   :  { %668 = vmatpush3.bf16.msra.mxu0 %v698_v24  ;;  %1272 = sst [smem:[#allocation12_spill]] %s853_s28  ;;  %v101_v28 = vstv %s853_s28 }
  0x2b   :  { %v822_v10 = vadd.f32 %v63_v8, %v61_v7  ;;  %669 = vmatprep.subr.bf16.mxu0 %v699_v25  ;;  %s865_s8 = sld [smem:[#allocation6 + $0x2a]]  ;;  %v131_v29 = vstv %s855_s29 }
  0x2c   :  { %s867_s9 = sld [smem:[#allocation6 + $0x31]]  ;;  %v167_v30 = vstv %s857_s0 }
  0x2d   :  { %s869_s10 = sld [smem:[#allocation6 + $0x3]]  ;;  %v203_v31 = vstv %s859_s1 }
  0x2e   :  { %v712_v4 = vpop.eup %711  ;;  %1273 = sst [smem:[#allocation13_spill]] %s861_s30  ;;  %v239_v32 = vstv %s861_s30 }
  0x2f   :  { %v54_v6 = vmul.f32 %v712_v4, %v53_v2  ;;  %1274 = sst [smem:[#allocation14_spill]] %s863_s7  ;;  %v268_v33 = vstv %s863_s7 }
  0x30   :  { %s871_s11 = sld [smem:[#allocation6 + $0xa]] }
  0x31   :  { %v818_v9 = vadd.f32 %v56_v5, %v54_v6  ;;  %1275 = sst [smem:[#allocation15_spill]] %s865_s8  ;;  %v303_v34 = vstv %s865_s8 }
  0x32   :  { %s873_s12 = sld [smem:[#allocation6 + $0x11]]  ;;  %v338_v35 = vstv %s867_s9  ;;  %s770_s9 = smov [#allocation8]  }
  0x33   :  { %68 = vrot.lane.b32.xlu0 %v818_v9, %s1240_s13  ;;  %1276 = sst [smem:[#allocation16_spill]] %s869_s10  ;;  %v104_v37 = vstv %s869_s10 }
  0x34   :  { %s879_s14 = sld [smem:[#allocation6 + $0x26]] }
  0x35   :  { %s881_s15 = sld [smem:[#allocation6 + $0x2d]] }
  0x36   :  { %1277 = sst [smem:[#allocation17_spill]] %s871_s11  ;;  %v134_v38 = vstv %s871_s11 }
  0x37   :  { %85 = vrot.lane.b32.xlu0 %v822_v10, %s1240_s13  ;;  %s883_s16 = sld [smem:[#allocation6 + $0x34]] }
  0x38   :  { %1278 = sst [smem:[#allocation18_spill]] %s873_s12  ;;  %v170_v39 = vstv %s873_s12 }
  0x39   :  { %s885_s17 = sld [smem:[#allocation6 + $0x24]] }
  0x3a   :  { %1280 = sst [smem:[#allocation20_spill]] %s879_s14  ;;  %v271_v45 = vstv %s879_s14 }
  0x3b   :  { %1281 = sst [smem:[#allocation21_spill]] %s881_s15  ;;  %v306_v46 = vstv %s881_s15 }
  0x3c   :  { %s887_s18 = sld [smem:[#allocation6 + $0x27]] }
  0x3d   :  { %1282 = sst [smem:[#allocation22_spill]] %s883_s16  ;;  %v341_v47 = vstv %s883_s16 }
  0x3e   :  { %s889_s19 = sld [smem:[#allocation6 + $0x25]] }
  0x3f   :  { %s891_s20 = sld [smem:[#allocation6 + $0x28]]  ;;  %v275_v36 = vstv %s885_s17 }
  0x40   :  { %s893_s21 = sld [smem:[#allocation6 + $0x8]]  ;;  %v971_v48 = vmul.f32 %v275_v36, %v818_v9 }
  0x41   :  { %s895_s22 = sld [smem:[#allocation6 + $0x29]] }
  0x42   :  { %s897_s23 = sld [smem:[#allocation6 + $0xb]]  ;;  %v279_v40 = vstv %s887_s18 }
  0x43   :  { %s899_s24 = sld [smem:[#allocation6 + $0x9]]  ;;  %v976_v49 = vmul.f32 %v279_v40, %v822_v10 }
  0x44   :  { %s901_s25 = sld [smem:[#allocation6 + $0xc]]  ;;  %v283_v50 = vstv %s889_s19 }
  0x45   :  { %1283 = sst [smem:[#allocation23_spill]] %s891_s20 }
  0x46   :  { %s903_s26 = sld [smem:[#allocation6 + $0xd]]  ;;  %v138_v43 = vstv %s893_s21 }
  0x47   :  { %1284 = sst [smem:[#allocation24_spill]] %s895_s22  ;;  %v986_v55 = vmul.f32 %v138_v43, %v818_v9 }
  0x48   :  { %s905_s27 = sld [smem:[#allocation6 + $0x2b]]  ;;  %v142_v44 = vstv %s897_s23 }
  0x49   :  { %1285 = sst [smem:[#allocation25_spill]] %s899_s24  ;;  %v989_v56 = vmul.f32 %v142_v44, %v822_v10 }
  0x4a   :  { %1286 = sst [smem:[#allocation26_spill]] %s901_s25 }
  0x4b   :  { %s909_s6 = sld [smem:[#allocation6 + $0x2c]] }
  0x4c   :  { %1287 = sst [smem:[#allocation27_spill]] %s903_s26 }
  0x4d   :  { %s911_s5 = sld [smem:[#allocation6 + $0x2f]] }
  0x4e   :  { %s913_s4 = sld [smem:[#allocation6 + $0x30]]  ;;  %v310_v51 = vstv %s905_s27 }
  0x4f   :  { %s915_s22 = sld [smem:[#allocation6 + $0xf]]  ;;  %v1002_v62 = vmul.f32 %v310_v51, %v818_v9 }
  0x50   :  { %s917_s24 = sld [smem:[#allocation6 + $0x12]] }
  0x51   :  { %1288 = sst [smem:[#allocation28_spill]] %s909_s6 }
  0x52   :  { %s919_s25 = sld [smem:[#allocation6 + $0x10]] }
  0x53   :  { %1289 = sst [smem:[#allocation29_spill]] %s911_s5 }
  0x54   :  { %1290 = sst [smem:[#allocation30_spill]] %s913_s4 }
  0x55   :  { %s921_s26 = sld [smem:[#allocation6 + $0x13]]  ;;  %v174_v59 = vstv %s915_s22 }
  0x56   :  { %1291 = sst [smem:[#allocation31_spill]] %s917_s24  ;;  %v1015_v5 = vmul.f32 %v174_v59, %v818_v9 }
  0x57   :  { %s923_s20 = sld [smem:[#allocation6 + $0x14]] }
  0x58   :  { %1292 = sst [smem:[#allocation32_spill]] %s919_s25 }
  0x59   :  { %s925_s6 = sld [smem:[#allocation6 + $0x32]] }
  0x5a   :  { %s927_s5 = sld [smem:[#allocation6 + $0x35]] }
  0x5b   :  { %1293 = sst [smem:[#allocation33_spill]] %s921_s26 }
  0x5c   :  { %s929_s4 = sld [smem:[#allocation6 + $0x33]] }
  0x5d   :  { %1294 = sst [smem:[#allocation34_spill]] %s923_s20 }
  0x5e   :  { %s931_s24 = sld [smem:[#allocation6 + $0x36]] }
  0x5f   :  { %s933_s25 = sld [smem:[#allocation6 + $0x37]]  ;;  %v345_v0 = vstv %s925_s6 }
  0x60   :  { %s935_s26 = sld [smem:[#allocation6 + $0x16]]  ;;  %v349_v4 = vstv %s927_s5 }
  0x61   :  { %s940_s20 = sld [smem:[#allocation6 + $0x19]] }
  0x62   :  { %s952_s28 = sld [smem:[#allocation6 + $0x1a]] }
  0x63   :  { %s958_s30 = sld [smem:[#allocation6 + $0x1d]] }
  0x64   :  { %1295 = sst [smem:[#allocation35_spill]] %s931_s24 }
  0x65   :  { %1296 = sst [smem:[#allocation36_spill]] %s933_s25  ;;  %v361_v21 = vstv %s933_s25 }
  0x66   :  { %s946_s24 = sld [smem:[#allocation6 + $0x17]] }
  0x67   :  { %s1297_s7 = sld [smem:[#allocation23_spill]] }
  0x68   :  { %s1298_s8 = sld [smem:[#allocation24_spill]]  ;;  %v222_v40 = vstv %s952_s28 }
  0x69   :  { %s965_s17 = sld [smem:[#allocation6 + $0x20]] }
  0x6a   :  { %s1299_s10 = sld [smem:[#allocation25_spill]] }
  0x6b   :  { %s1300_s11 = sld [smem:[#allocation26_spill]] }
  0x6c   :  { %s1301_s18 = sld [smem:[#allocation31_spill]]  ;;  %v218_v36 = vstv %s946_s24 }
  0x6d   :  { %s973_s12 = sld [smem:[#allocation6 + $0x1]]  ;;  %v287_v53 = vstv %s1297_s7 }
  0x6e   :  { %s981_s21 = sld [smem:[#allocation6 + $0x4]]  ;;  %v291_v54 = vstv %s1298_s8 }
  0x6f   :  { %s1303_s23 = sld [smem:[#allocation28_spill]] }
  0x70   :  { %s1304_s16 = sld [smem:[#allocation29_spill]]  ;;  %v146_v57 = vstv %s1299_s10 }
  0x71   :  { %s1305_s15 = sld [smem:[#allocation30_spill]]  ;;  %v150_v58 = vstv %s1300_s11 }
  0x72   :  { %s991_s14 = sld [smem:[#allocation6 + $0x1b]]  ;;  %v178_v60 = vstv %s1301_s18  ;;  %s768_s18 = smov 64  }
  0x73   :  { %s1308_s27 = sld [smem:[#allocation33_spill]]  ;;  %v1018_v6 = vmul.f32 %v178_v60, %v822_v10  ;;  %v108_v22 = vstv %s973_s12 }
  0x74   :  { %s1309_s7 = sld [smem:[#allocation34_spill]]  ;;  %v112_v23 = vstv %s981_s21  ;;  %s769_s21 = smov 96  }
  0x75   :  { %s998_s8 = sld [smem:[#allocation6 + $0x1e]]  ;;  %v318_v1 = vstv %s1303_s23  ;;  %v1058_v60 = vmul.f32 %v112_v23, %v822_v10 }
  0x76   :  { %s1008_s10 = sld [smem:[#allocation6 + $0x21]]  ;;  %v322_v2 = vstv %s1304_s16 }
  0x77   :  { %s1310_s22 = sld [smem:[#allocation35_spill]]  ;;  %v326_v3 = vstv %s1305_s15 }
  0x78   :  { %1306 = sst [smem:[#allocation26_spill]] %s991_s14 }
  0x79   :  { %v186_v8 = vstv %s1308_s27  ;;  %s1147_s16 = sld [smem:[#allocation6 + $0x2]] }
  0x7a   :  { %s1197_s6 = sld [smem:[#allocation6 + $0x6]] }
  0x7b   :  { %s1330_s1 = sld [smem:[#allocation38_spill]] }
  0x7c   :  { %v258_v59 = vstv %s1008_s10 }
  0x7d   :  { %v357_v20 = vstv %s1310_s22  ;;  %s1169_s22 = sld [smem:[#allocation6 + $0x5]] }
  0xa5   :  { %v69_v11 = vpop.permute.xlu0 %68 }
  0xa6   :  { %v70_v12 = vsel %vm67_vm0, %v69_v11, %v818_v9  ;;  %v190_v11 = vstv %s1309_s7  ;;  %s1327_s7 = sld [smem:[#allocation26_spill]] }
  0xa7   :  { %71 = vrot.lane.b32.xlu1 %v70_v12, %s1240_s13  ;;  %v1024_v12 = vmul.f32 %v345_v0, %v818_v9  ;;  %v1061_v0 = vmul.f32 %v108_v22, %v818_v9 }
  0xa9   :  { %v86_v13 = vpop.permute.xlu0 %85 }
  0xaa   :  { %v87_v14 = vsel %vm67_vm0, %v86_v13, %v822_v10  ;;  %v210_v13 = vstv %s935_s26  ;;  %s1328_s26 = smov 32  }
  0xab   :  { %88 = vrot.lane.b32.xlu1 %v87_v14, %s1240_s13  ;;  %s907_s13 = sld [smem:[#allocation6 + $0x2e]]  ;;  %v214_v14 = vstv %s940_s20  ;;  %v1041_v25 = vmul.f32 %v210_v13, %v818_v9 }
  0xac   :  { %v1044_v26 = vmul.f32 %v214_v14, %v822_v10 }
  0xb1   :  { %v314_v52 = vstv %s907_s13  ;;  %s1307_s13 = sld [smem:[#allocation32_spill]] }
  0xb2   :  { %v1005_v63 = vmul.f32 %v314_v52, %v822_v10  ;;  %v254_v52 = vstv %s998_s8 }
  0xb7   :  { %v182_v7 = vstv %s1307_s13 }
 0x119   :  { %v72_v15 = vpop.permute.xlu1 %71 }
 0x11a   :  { %v73_v16 = vsel %vm67_vm0, %v72_v15, %v818_v9  ;;  %v1029_v15 = vmul.f32 %v349_v4, %v822_v10 }
 0x11b   :  { %76 = vrot.lane.b32.xlu0 %v73_v16, %s766_s2 }
 0x11d   :  { %v89_v17 = vpop.permute.xlu1 %88 }
 0x11e   :  { %v90_v18 = vsel %vm67_vm0, %v89_v17, %v822_v10  ;;  %v246_v17 = vstv %s958_s30 }
 0x11f   :  { %81 = vrot.lane.b32.xlu0 %v73_v16, %s767_s3  ;;  %92 = vrot.lane.b32.xlu1 %v90_v18, %s766_s2  ;;  %s875_s2 = sld [smem:[#allocation6 + $0x18]]  ;;  %v353_v16 = vstv %s929_s4  ;;  %v1053_v51 = vmul.f32 %v246_v17, %v818_v9 }
 0x120   :  { %s1158_s4 = sld [smem:[#allocation6 + $0x22]] }
 0x123   :  { %96 = vrot.lane.b32.xlu1 %v90_v18, %s767_s3  ;;  %s877_s3 = sld [smem:[#allocation6 + $0x1f]]  ;;  %v250_v18 = vstv %s965_s17 }
 0x124   :  { %v1050_v44 = vmul.f32 %v250_v18, %v822_v10 }
 0x125   :  { %v206_v41 = vstv %s875_s2  ;;  %s1324_s2 = sld [smem:[#allocation37_spill]] }
 0x129   :  { %1279 = sst [smem:[#allocation19_spill]] %s877_s3  ;;  %v242_v42 = vstv %s877_s3 }
 0x12a   :  { %s1302_s3 = sld [smem:[#allocation27_spill]] }
 0x130   :  { %v154_v61 = vstv %s1302_s3 }
 0x18d   :  { %v77_v19 = vpop.permute.xlu0 %76 }
 0x18e   :  { %v79_v24 = vsel %vm74_vm1, 0.0, %v77_v19 }
 0x18f   :  { %v1065_v4 = vmul.f32 %v101_v28, %v79_v24  ;;  %v132_v13 = vmul.f32 %v131_v29, %v79_v24  ;;  %v168_v14 = vmul.f32 %v167_v30, %v79_v24  ;;  %v204_v17 = vmul.f32 %v203_v31, %v79_v24 }
 0x190   :  { %v240_v9 = vmul.f32 %v239_v32, %v79_v24  ;;  %v269_v19 = vmul.f32 %v268_v33, %v79_v24  ;;  %v304_v30 = vmul.f32 %v303_v34, %v79_v24  ;;  %v339_v22 = vmul.f32 %v338_v35, %v79_v24 }
 0x191   :  { %v93_v10 = vpop.permute.xlu1 %92  ;;  %v82_v18 = vpop.permute.xlu0 %81 }
 0x192   :  { %v95_v28 = vsel %vm74_vm1, 0.0, %v93_v10  ;;  %v1081_v29 = vsel %vm80_vm2, 0.0, %v82_v18 }
 0x193   :  { %v135_v31 = vmul.f32 %v134_v38, %v95_v28  ;;  %v171_v23 = vmul.f32 %v170_v39, %v95_v28  ;;  %v1093_v32 = vmul.f32 %v104_v37, %v95_v28  ;;  %v207_v33 = vmul.f32 %v206_v41, %v95_v28 }
 0x194   :  { %v272_v10 = vmul.f32 %v271_v45, %v95_v28  ;;  %v307_v18 = vmul.f32 %v306_v46, %v95_v28  ;;  %v243_v34 = vmul.f32 %v242_v42, %v95_v28  ;;  %v342_v35 = vmul.f32 %v341_v47, %v95_v28 }
 0x195   :  { %v97_v24 = vpop.permute.xlu1 %96  ;;  %v284_v38 = vmul.f32 %v283_v50, %v1081_v29  ;;  %v136_v37 = vadd.f32 %v135_v31, %v132_v13  ;;  %v172_v43 = vadd.f32 %v171_v23, %v168_v14  ;;  %v147_v47 = vmul.f32 %v146_v57, %v1081_v29 }
 0x196   :  { %v1110_v39 = vsel %vm80_vm2, 0.0, %v97_v24  ;;  %v273_v41 = vadd.f32 %v272_v10, %v269_v19  ;;  %v308_v45 = vadd.f32 %v307_v18, %v304_v30  ;;  %v319_v50 = vmul.f32 %v318_v1, %v1081_v29 }
 0x197   :  { %v288_v46 = vmul.f32 %v287_v53, %v1110_v39  ;;  %v140_v42 = vadd.f32 %v986_v55, %v136_v37  ;;  %v151_v27 = vmul.f32 %v150_v58, %v1110_v39  ;;  %v176_v19 = vadd.f32 %v1015_v5, %v172_v43  ;;  %v701_v58 = vld [vmem:[%s1324_s2 + $0x58] sm:$0xff]  }
 0x198   :  { %v277_v13 = vadd.f32 %v971_v48, %v273_v41  ;;  %v312_v14 = vadd.f32 %v1002_v62, %v308_v45  ;;  %v323_v55 = vmul.f32 %v322_v2, %v1110_v39  ;;  %v183_v57 = vmul.f32 %v182_v7, %v1081_v29  ;;  %v700_v48 = vld [vmem:[%s1324_s2 + $0x20] sm:$0xff]  }
 0x199   :  { %v144_v53 = vadd.f32 %v989_v56, %v140_v42  ;;  %v343_v28 = vadd.f32 %v342_v35, %v339_v22  ;;  %v180_v1 = vadd.f32 %v1018_v6, %v176_v19  ;;  %v187_v2 = vmul.f32 %v186_v8, %v1110_v39  ;;  %670 = vmatpush3.bf16.msra.mxu0 %v700_v48 }
 0x19a   :  { %v281_v62 = vadd.f32 %v976_v49, %v277_v13  ;;  %v316_v56 = vadd.f32 %v1005_v63, %v312_v14  ;;  %v354_v43 = vmul.f32 %v353_v16, %v1081_v29  ;;  %v208_v30 = vadd.f32 %v207_v33, %v204_v17  ;;  %671 = vmatprep.subr.bf16.mxu0 %v701_v58  ;;  %v702_v17 = vld [vmem:[%s1324_s2 + $0x18] sm:$0xff]  }
 0x19b   :  { %v148_v5 = vadd.f32 %v147_v47, %v144_v53  ;;  %v347_v7 = vadd.f32 %v1024_v12, %v343_v28  ;;  %v184_v63 = vadd.f32 %v183_v57, %v180_v1  ;;  %v358_v6 = vmul.f32 %v357_v20, %v1110_v39  ;;  %v703_v20 = vld [vmem:[%s1324_s2 + $0x50] sm:$0xff]   ;;  %v706_v47 = vld [vmem:[%s1324_s2 + $0x8] sm:$0xff]  }
 0x19c   :  { %v285_v22 = vadd.f32 %v284_v38, %v281_v62  ;;  %v320_v49 = vadd.f32 %v319_v50, %v316_v56  ;;  %v212_v12 = vadd.f32 %v1041_v25, %v208_v30  ;;  %v244_v16 = vadd.f32 %v243_v34, %v240_v9  ;;  %v708_v62 = vld [vmem:[%s1324_s2] sm:$0xff]  }
 0x19d   :  { %v152_v8 = vadd.f32 %v151_v27, %v148_v5  ;;  %v351_v31 = vadd.f32 %v1029_v15, %v347_v7  ;;  %v188_v10 = vadd.f32 %v187_v2, %v184_v63  ;;  %v219_v15 = vmul.f32 %v218_v36, %v1081_v29  ;;  %672 = vmatpush3.bf16.msra.mxu0 %v702_v17  ;;  %v707_v27 = vld [vmem:[%s1324_s2 + $0x40] sm:$0xff]  }
 0x19e   :  { %v289_v23 = vadd.f32 %v288_v46, %v285_v22  ;;  %v324_v33 = vadd.f32 %v323_v55, %v320_v49  ;;  %v216_v18 = vadd.f32 %v1044_v26, %v212_v12  ;;  %v223_v34 = vmul.f32 %v222_v40, %v1110_v39  ;;  %673 = vmatprep.subr.bf16.mxu0 %v703_v20  ;;  %v704_v40 = vld [vmem:[%s1324_s2 + $0x10] sm:$0xff]  }
 0x19f   :  { %v155_v25 = vadd.f32 %v154_v61, %v152_v8  ;;  %v355_v9 = vadd.f32 %v354_v43, %v351_v31  ;;  %v191_v38 = vadd.f32 %v190_v11, %v188_v10  ;;  %v248_v36 = vadd.f32 %v1053_v51, %v244_v16 }
 0x1a0   :  { %v292_v35 = vadd.f32 %v291_v54, %v289_v23  ;;  %v327_v24 = vadd.f32 %v326_v3, %v324_v33  ;;  %v220_v41 = vadd.f32 %v219_v15, %v216_v18  ;;  %v106_v26 = vadd.f32 %v1093_v32, %v1065_v4  ;;  %v705_v54 = vld [vmem:[%s1324_s2 + $0x48] sm:$0xff]   ;;  %v638_v15 = vld [vmem:[%s1330_s1] ss:$0 sm:$0xff]  ;;  %s564_s2 = sshll.u32 %s770_s9, 4  ;;  %s565_s2 = int_to_ptr.vmem [resolvable:$true] %s564_s2 }
 0x1a1   :  { %v156_v61 = vmax.f32 %v155_v25, 0.0  ;;  %v359_v37 = vadd.f32 %v358_v6, %v355_v9  ;;  %v255_v11 = vmul.f32 %v254_v52, %v1081_v29  ;;  %v252_v51 = vadd.f32 %v1050_v44, %v248_v36  ;;  %674 = vmatpush3.bf16.msra.mxu0 %v704_v40  ;;  %s737_s11 = scalar_lea.vmem %s565_s2, 64  ;;  %p742_p11 = scmp.lt.s32.totalorder %s565_s2, %s565_s2 }
 0x1a2   :  { %v293_v3 = vmax.f32 %v292_v35, 0.0  ;;  %v116_v45 = vstv %s1147_s16  ;;  %v192_v32 = vmax.f32 %v191_v38, 0.0  ;;  %v224_v46 = vadd.f32 %v223_v34, %v220_v41  ;;  %675 = vmatprep.subr.bf16.mxu0 %v705_v54  ;;  %p738_p10 = scmp.ne.s32.totalorder %s565_s2, %s737_s11  ;;  %p743_p12 = scmp.lt.s32.totalorder %s737_s11, %s737_s11 }
 0x1a3   :  { %v657_v4 = vpack.c.bf16 %v156_v61, %v156_v61  ;;  %v259_v42 = vmul.f32 %v258_v59, %v1110_v39  ;;  %v328_v50 = vmax.f32 %v327_v24, 0.0  ;;  %v362_v44 = vadd.f32 %v361_v21, %v359_v37 }
 0x1a4   :  { %v660_v52 = vpack.c.bf16 %v293_v3, %v293_v3  ;;  %v256_v13 = vadd.f32 %v255_v11, %v252_v51  ;;  %v1329_v14 = vstv %s1327_s7  ;;  %v262_v59 = vstv %s1158_s4  ;;  %p744_p13 = por %p743_p12, %p742_p11 }
 0x1a5   :  { %161 = vrot.lane.b32.xlu0 %v657_v4, %s1328_s26  ;;  %v227_v19 = vadd.f32 %v1329_v14, %v224_v46  ;;  %v110_v53 = vadd.f32 %v1061_v0, %v106_v26  ;;  %v120_v57 = vstv %s1169_s22  ;;  %v658_v28 = vpack.c.bf16 %v192_v32, %v192_v32  ;;  %676 = vmatpush3.bf16.msra.mxu0 %v706_v47 }
 0x1a6   :  { %298 = vrot.lane.b32.xlu1 %v660_v52, %s1328_s26  ;;  %v260_v55 = vadd.f32 %v259_v42, %v256_v13  ;;  %v117_v48 = vmul.f32 %v116_v45, %v1081_v29  ;;  %v661_v56 = vpack.c.bf16 %v328_v50, %v328_v50  ;;  %v363_v1 = vmax.f32 %v362_v44, 0.0  ;;  %677 = vmatprep.subr.bf16.mxu0 %v707_v27  ;;  %p745_p0 = pnand %p744_p13, %p738_p10 }
 0x1a7   :  { %v228_v21 = vmax.f32 %v227_v19, 0.0  ;;  %v114_v58 = vadd.f32 %v1058_v60, %v110_v53  ;;  %v121_v0 = vmul.f32 %v120_v57, %v1110_v39  ;;  %v124_v43 = vstv %s1197_s6 }
 0x1a8   :  { %v263_v2 = vadd.f32 %v262_v59, %v260_v55  ;;  %v662_v30 = vpack.c.bf16 %v363_v1, %v363_v1 }
 0x1a9   :  { %197 = vrot.lane.b32.xlu0 %v658_v28, %s768_s18  ;;  %v118_v5 = vadd.f32 %v117_v48, %v114_v58  ;;  %v659_v29 = vpack.c.bf16 %v228_v21, %v228_v21  ;;  %678 = vmatpush3.bf16.msra.mxu0 %v708_v62 }
 0x1aa   :  { %333 = vrot.lane.b32.xlu1 %v661_v56, %s768_s18  ;;  %v264_v7 = vmax.f32 %v263_v2, 0.0 }
 0x1ab   :  { %v122_v60 = vadd.f32 %v121_v0, %v118_v5 }
 0x1ac   :  { %v265_v22 = vpack.c.bf16 %v264_v7, %v264_v7 }
 0x1ad   :  { %233 = vrot.lane.b32.xlu0 %v659_v29, %s769_s21  ;;  %v125_v49 = vadd.f32 %v124_v43, %v122_v60 }
 0x1ae   :  { %368 = vrot.lane.b32.xlu1 %v662_v30, %s769_s21  ;;  %266 = vst.msk [vmem:[#allocation2 + $0x4] sm:$0xf] %vm128_vm3, %v265_v22 }
 0x1af   :  { %v126_v63 = vmax.f32 %v125_v49, 0.0 }
 0x1b1   :  { %v127_v6 = vpack.c.bf16 %v126_v63, %v126_v63 }
 0x1b3   :  { %129 = vst.msk [vmem:[#allocation2] sm:$0xf] %vm128_vm3, %v127_v6 }
 0x217   :  { %v162_v39 = vpop.permute.xlu0 %161 }
 0x218   :  { %v299_v8 = vpop.permute.xlu1 %298  ;;  %165 = vst.msk [vmem:[#allocation2] sm:$0xf] %vm164_vm4, %v162_v39 }
 0x219   :  { %301 = vst.msk [vmem:[#allocation2 + $0x4] sm:$0xf] %vm164_vm4, %v299_v8 }
 0x21b   :  { %v198_v31 = vpop.permute.xlu0 %197 }
 0x21c   :  { %v334_v12 = vpop.permute.xlu1 %333  ;;  %201 = vst.msk [vmem:[#allocation2] sm:$0xf] %vm200_vm5, %v198_v31 }
 0x21d   :  { %336 = vst.msk [vmem:[#allocation2 + $0x4] sm:$0xf] %vm200_vm5, %v334_v12 }
 0x21f   :  { %v234_v16 = vpop.permute.xlu0 %233 }
 0x220   :  { %v369_v17 = vpop.permute.xlu1 %368  ;;  %237 = vst.msk [vmem:[#allocation2] sm:$0xf] %vm236_vm6, %v234_v16 }
 0x221   :  { %371 = vst.msk [vmem:[#allocation2 + $0x4] sm:$0xf] %vm236_vm6, %v369_v17 }
 0x228   :  { %v372_v20 = vld [vmem:[#allocation2] sm:$0xff] }
 0x229   :  { %v639_v23 = vcombine.low %v372_v20, %v372_v20  ;;  %v640_v33 = vcombine.high %v372_v20, %v372_v20 }
 0x22b   :  { %547 = vmatprep.mubr.bf16.mxu0 %v640_v33 }
 0x22c   :  { %548 = vmatmul.mubr.bf16.vlgmr.msra.gmra.mxu0 %v639_v23 }
 0x2ec   :  { %v679_v10 = vpop.f32.mrf.mxu0 }
 0x2ee   :  { %v680_v25 = vpop.f32.mrf.mxu0 }
 0x2ef   :  { %v681_v9 = vadd.f32 %v680_v25, %v679_v10 }
 0x2f0   :  { %v682_v18 = vpop.f32.mrf.mxu0 }
 0x2f1   :  { %v550_v34 = vadd.f32 %v681_v9, %v638_v15 }
 0x2f2   :  { %v683_v35 = vpop.f32.mrf.mxu0 }
 0x2f3   :  { %v555_v24 = vmax.f32 %v550_v34, 0.0 }
 0x2f5   :  { %v556_v38 = vpack.c.bf16 %v555_v24, %v555_v24 }
 0x2f7   :  { %557 = vst.msk [vmem:[#allocation8] sm:$0xf] %vm128_vm3, %v556_v38 }
 0x2f8   :  { %748 = shalt.err (!%p745_p0)
}
 0x2f9   :  { %s1331_s19 = sld [smem:[#allocation39_spill]] }
 0x2ff   :  { %567 = dma.vmem_to_hbm [thread:$0]  %s565_s2, 64, %s1331_s19, [#allocation4]  }
 0x300   :  { %761 = dma.done.wait [#allocation4], 64  }
 0x301   :  { %762 = vsyncadd [#allocation4], 4294967232 }
 0x302   :  { %571 = vsyncpa [#allocation4], 1 }
 0x303   :  { %572 = vsyncpa [#allocation5], 1 }
 0x304   :  { %573 = vsyncpa [#allocation7], 1 }

</bundles_post_ra>
